<compile_context>
chip_gen: v6e
topology: v6e:2x2x1
jax: 0.10.0
libtpu: 0.0.40
codegen_flags: <defaults>
</compile_context>

<pallas_src>
import functools

import jax
import jax.numpy as jnp
from jax import lax
from jax.experimental import pallas as pl
from jax.experimental.pallas import tpu as pltpu


def _round_up(x, m):
    return ((x + m - 1) // m) * m


def _dmskd_tile_kernel(lab_col_ref, lab_row_ref, lhs_ref, rhs_ref,
                       s_all_ref, s_intra_ref, *, lhs_position_major):
    """One (i-tile, j-tile) block of the fused (S_sim - T_sim)^2 reduction.

    lhs = [norm(fS); norm(fT)] * valid_row  (bf16, i-role, pre-packed)
    rhs = [norm(fS); -norm(fT)]             (bf16, j-role, pre-packed)
    so contraction gives valid_row * (S_sim - T_sim); err = diff^2 is already
    row-masked.  Only sublane reduces here; lane/tile reduce in the epilogue.
    """
    # Zero the per-(batch, i-tile) lane accumulators on the first j step.
    @pl.when(pl.program_id(2) == 0)
    def _():
        s_all_ref[...] = jnp.zeros_like(s_all_ref)
        s_intra_ref[...] = jnp.zeros_like(s_intra_ref)

    if lhs_position_major:
        # lhs_ref: (1, TI, 2Cp), rhs_ref: (1, 2Cp, TJ) -> natural MXU matmul.
        diff = jnp.dot(lhs_ref[0], rhs_ref[0],
                       preferred_element_type=jnp.float32)
    else:
        # Channel-major LHS (2Cp < 128): contract dim 0 of both operands.
        dn = (((0,), (0,)), ((), ()))
        diff = lax.dot_general(lhs_ref[0], rhs_ref[0], dn,
                               preferred_element_type=jnp.float32)

    err = diff * diff                                    # (TI, TJ), row-masked

    lab_c = lab_col_ref[0]                               # (TI, 1) sanitized i-labels
    lab_r = lab_row_ref[0]                               # (1, TJ) raw j-labels
    err_intra = jnp.where(lab_c == lab_r, err, 0.0)      # intra pairs only

    # Lane-dense accumulation into the resident (1,1,1,TN) output blocks.
    s_all_ref[...] += jnp.sum(err, axis=0, keepdims=True)
    s_intra_ref[...] += jnp.sum(err_intra, axis=0, keepdims=True)


def _vmem_budget():
    """(physical_vmem, vmem_limit_bytes) with a conservative fallback."""
    cap = None
    try:
        cap = getattr(pltpu.get_tpu_info(), "vmem_capacity_bytes", None)
    except Exception:
        cap = None
    if not cap:
        cap = 64 << 20                       # conservative (v7x-sized)
    # v7x (64 MiB phys) -> 48 MiB limit; v5e/v6e (128 MiB) -> 64 MiB limit.
    limit = int(min(max(cap - (16 << 20), 32 << 20), 64 << 20))
    return int(cap), limit


def dmskd_forward(feat_S, feat_T, targets, *, num_class, ignore_label,
                  use_bf16_matmul=True):
    """Returns (intra_sim.mean(), inter_sim.mean()), matching the torch module.

    feat_S, feat_T: (B, C, H, W) float32   (NCHW, like PyTorch)
    targets:        (B, Ht, Wt)  int label map
    """
    B, C, H, W = feat_S.shape
    ph, pw = 2, 2
    Hp = -(-H // ph)
    Wp = -(-W // pw)

    # MaxPool2d(kernel=2, stride=2, ceil_mode=True) -- plain-JAX glue.
    def maxpool(x):
        pad_h, pad_w = Hp * ph - H, Wp * pw - W
        x = jnp.pad(x, ((0, 0), (0, 0), (0, pad_h), (0, pad_w)),
                    constant_values=-jnp.inf)
        return lax.reduce_window(x, -jnp.inf, lax.max,
                                 (1, 1, ph, pw), (1, 1, ph, pw), 'VALID')

    fS = maxpool(feat_S.astype(jnp.float32))
    fT = maxpool(feat_T.astype(jnp.float32))

    # F.interpolate(mode='nearest') on labels: src = floor(dst * in / out)
    Ht, Wt = targets.shape[-2:]
    ih = (jnp.arange(Hp) * Ht) // Hp
    iw = (jnp.arange(Wp) * Wt) // Wp
    labels = targets[:, ih[:, None], iw[None, :]].reshape(B, Hp * Wp)   # (B, N)

    N = Hp * Wp
    Cp = _round_up(C, 8)                     # sublane-align channels

    # ---- tile-size selection (decoupled from N divisibility) ----
    vmem_cap, vmem_limit = _vmem_budget()
    npad128 = _round_up(N, 128)
    elt = 2 if use_bf16_matmul else 4
    candidates = ([1024] if vmem_cap >= (100 << 20) else []) + [512, 256, 128]
    TN = 128
    for t in candidates:
        if t > npad128:
            continue
        feat_bytes = 2 * 2 * (2 * Cp) * t * elt          # 2 roles, double-buffered
        tmp_bytes = 6 * t * t * 4                        # (TN,TN) f32 temporaries
        if feat_bytes + tmp_bytes <= int(0.7 * vmem_limit):
            TN = t
            break
    Npad = _round_up(N, TN)
    nT = Npad // TN
    pad_n = Npad - N

    # ---- hoisted prep: normalize, mask-fold, stack, cast (all O(C*N)) ----
    fS = fS.reshape(B, C, N)
    fT = fT.reshape(B, C, N)

    def channel_normalize(x):
        # F.normalize(p=2, dim=channel), eps=1e-12 == x * rsqrt(max(|x|^2, eps^2))
        ssq = jnp.sum(x * x, axis=1, keepdims=True)
        return x * lax.rsqrt(jnp.maximum(ssq, 1e-24))

    fS = channel_normalize(fS)
    fT = channel_normalize(fT)

    valid = (labels != ignore_label).astype(jnp.float32)                 # (B, N)

    fS = jnp.pad(fS, ((0, 0), (0, Cp - C), (0, pad_n)))
    fT = jnp.pad(fT, ((0, 0), (0, Cp - C), (0, pad_n)))
    valid_p = jnp.pad(valid, ((0, 0), (0, pad_n)))

    mm_dtype = jnp.bfloat16 if use_bf16_matmul else jnp.float32
    # RHS (j-role, channel-major): [norm(fS); -norm(fT)]     -> (B, 2Cp, Npad)
    rhs = jnp.concatenate([fS, -fT], axis=1).astype(mm_dtype)
    # LHS (i-role): row-validity folded in so err is pre-masked.
    lhs_cm = (jnp.concatenate([fS, fT], axis=1) * valid_p[:, None, :]).astype(mm_dtype)
    lhs_position_major = (2 * Cp) >= 128
    lhs = jnp.transpose(lhs_cm, (0, 2, 1)) if lhs_position_major else lhs_cm

    # Sanitized i-labels: out-of-range (incl. ignore) -> -1, so the in-kernel
    # intra mask is a single equality compare.
    labf = labels.astype(jnp.float32)
    in_range = (labf >= 0.0) & (labf < float(num_class))
    lab_i = jnp.where(in_range, labf, -1.0)
    lab_i = jnp.pad(lab_i, ((0, 0), (0, pad_n)), constant_values=-1.0)
    lab_j = jnp.pad(labf, ((0, 0), (0, pad_n)), constant_values=-2.0)
    lab_col = lab_i.reshape(B, Npad, 1)
    lab_row = lab_j.reshape(B, 1, Npad)

    kernel = functools.partial(_dmskd_tile_kernel,
                               lhs_position_major=lhs_position_major)

    acc_shape = jax.ShapeDtypeStruct((B, nT, 1, TN), jnp.float32)
    acc_spec = pl.BlockSpec((1, 1, 1, TN), lambda b, i, j: (b, i, 0, 0))
    if lhs_position_major:
        lhs_spec = pl.BlockSpec((1, TN, 2 * Cp), lambda b, i, j: (b, i, 0))
    else:
        lhs_spec = pl.BlockSpec((1, 2 * Cp, TN), lambda b, i, j: (b, 0, i))
    rhs_spec = pl.BlockSpec((1, 2 * Cp, TN), lambda b, i, j: (b, 0, j))

    s_all_t, s_intra_t = pl.pallas_call(
        kernel,
        out_shape=[acc_shape, acc_shape],
        grid_spec=pltpu.PrefetchScalarGridSpec(
            num_scalar_prefetch=0,
            grid=(B, nT, nT),
            in_specs=[
                pl.BlockSpec((1, TN, 1), lambda b, i, j: (b, i, 0)),   # sanitized labels (col, i)
                pl.BlockSpec((1, 1, TN), lambda b, i, j: (b, 0, j)),   # raw labels (row, j)
                lhs_spec,                                              # packed LHS, i-tile
                rhs_spec,                                              # packed RHS, j-tile
            ],
            out_specs=[acc_spec, acc_spec],
        ),
        compiler_params=pltpu.CompilerParams(
            dimension_semantics=("parallel", "parallel", "arbitrary"),
            vmem_limit_bytes=vmem_limit),
    )(lab_col, lab_row, lhs, rhs)

    # ---- epilogue (tiny, plain JAX) ----
    # TODO(synk): reference accumulates in float64; sums here are f32 but
    # tile/lane-distributed, which keeps drift small for realistic N.
    s_all = s_all_t.sum(axis=(1, 2, 3))                                  # (B,)
    s_intra = s_intra_t.sum(axis=(1, 2, 3))                              # (B,)

    valid_rows = valid.sum(axis=1)                                       # (B,)
    class_ids = jnp.arange(num_class, dtype=labels.dtype)
    onehot = (labels[:, :, None] == class_ids[None, None, :]).astype(jnp.float32)
    col_count = onehot.sum(axis=1)                                       # (B, nc)
    row_count = (onehot * valid[:, :, None]).sum(axis=1)                 # (B, nc)
    p_intra = (row_count * col_count).sum(axis=1)                        # (B,)

    intra_sim = s_intra / (p_intra + 1e-12)
    inter_sim = (s_all - s_intra) / (valid_rows * float(N) - p_intra + 1e-12)
    return intra_sim.mean(), inter_sim.mean()


if __name__ == "__main__":
    B, C, H, W = 2, 4, 16, 16
    num_class = 5
    ignore_label = 255

    key = jax.random.PRNGKey(0)
    k1, k2, k3, k4 = jax.random.split(key, 4)
    feat_S = jax.random.normal(k1, (B, C, H, W), dtype=jnp.float32)
    feat_T = jax.random.normal(k2, (B, C, H, W), dtype=jnp.float32)
    targets = jax.random.randint(k3, (B, H, W), 0, num_class, dtype=jnp.int32)
    # sprinkle in some ignore pixels
    ign = jax.random.bernoulli(k4, 0.1, (B, H, W))
    targets = jnp.where(ign, ignore_label, targets)

    intra_loss, inter_loss = dmskd_forward(
        feat_S, feat_T, targets, num_class=num_class, ignore_label=ignore_label)
    jax.block_until_ready((intra_loss, inter_loss))
    print("KERNEL_OK")
</pallas_src>

<mosaic_0001>
module attributes {stable_mosaic.version = 11 : i64} {
  func.func @_dmskd_tile_kernel(%arg0: i32, %arg1: i32, %arg2: i32, %arg3: memref<1x128x1xf32, #tpu.memory_space<vmem>>, %arg4: memref<1x1x128xf32, #tpu.memory_space<vmem>>, %arg5: memref<1x16x128xbf16, #tpu.memory_space<vmem>>, %arg6: memref<1x16x128xbf16, #tpu.memory_space<vmem>>, %arg7: memref<1x1x1x128xf32, #tpu.memory_space<vmem>>, %arg8: memref<1x1x1x128xf32, #tpu.memory_space<vmem>>) attributes {dimension_semantics = [#tpu.dimension_semantics<parallel>, #tpu.dimension_semantics<parallel>, #tpu.dimension_semantics<arbitrary>], iteration_bounds = array<i64: 2, 1, 1>, scalar_prefetch = 0 : i64, scratch_operands = 0 : i64, tpu.core_type = #tpu.core_type<tc>, window_params = [{transform_indices = @transform_0, window_bounds = array<i64: 1, 128, 1>}, {transform_indices = @transform_1, window_bounds = array<i64: 1, 1, 128>}, {transform_indices = @transform_2, window_bounds = array<i64: 1, 16, 128>}, {transform_indices = @transform_3, window_bounds = array<i64: 1, 16, 128>}, {transform_indices = @transform_4, window_bounds = array<i64: 1, 1, 1, 128>}, {transform_indices = @transform_5, window_bounds = array<i64: 1, 1, 1, 128>}]} {
    %c0_i32 = arith.constant 0 : i32
    %0 = arith.cmpi eq, %arg2, %c0_i32 : i32
    %1 = arith.extui %0 : i1 to i32
    %c0_i32_0 = arith.constant 0 : i32
    %2 = arith.cmpi ne, %1, %c0_i32_0 : i32
    scf.if %2 {
      %cst_31 = arith.constant 0.000000e+00 : f32
      %30 = vector.broadcast %cst_31 : f32 to vector<1x1x1x128xf32>
      %c0_32 = arith.constant 0 : index
      %c0_33 = arith.constant 0 : index
      %c0_34 = arith.constant 0 : index
      %c0_35 = arith.constant 0 : index
      %31 = vector.load %arg7[%c0_32, %c0_33, %c0_34, %c0_35] : memref<1x1x1x128xf32, #tpu.memory_space<vmem>>, vector<1x1x1x128xf32>
      tpu.vector_store %arg7[%c0_32, %c0_33, %c0_34, %c0_35], %30 {strides = array<i32>} : memref<1x1x1x128xf32, #tpu.memory_space<vmem>>, vector<1x1x1x128xf32>,
      %cst_36 = arith.constant 0.000000e+00 : f32
      %32 = vector.broadcast %cst_36 : f32 to vector<1x1x1x128xf32>
      %c0_37 = arith.constant 0 : index
      %c0_38 = arith.constant 0 : index
      %c0_39 = arith.constant 0 : index
      %c0_40 = arith.constant 0 : index
      %33 = vector.load %arg8[%c0_37, %c0_38, %c0_39, %c0_40] : memref<1x1x1x128xf32, #tpu.memory_space<vmem>>, vector<1x1x1x128xf32>
      tpu.vector_store %arg8[%c0_37, %c0_38, %c0_39, %c0_40], %32 {strides = array<i32>} : memref<1x1x1x128xf32, #tpu.memory_space<vmem>>, vector<1x1x1x128xf32>,
    } else {
    }
    %c0 = arith.constant 0 : index
    %c0_1 = arith.constant 0 : index
    %c0_2 = arith.constant 0 : index
    %3 = vector.load %arg5[%c0, %c0_1, %c0_2] : memref<1x16x128xbf16, #tpu.memory_space<vmem>>, vector<1x16x128xbf16>
    %4 = vector.shape_cast %3 : vector<1x16x128xbf16> to vector<16x128xbf16>
    %c0_3 = arith.constant 0 : index
    %c0_4 = arith.constant 0 : index
    %c0_5 = arith.constant 0 : index
    %5 = vector.load %arg6[%c0_3, %c0_4, %c0_5] : memref<1x16x128xbf16, #tpu.memory_space<vmem>>, vector<1x16x128xbf16>
    %6 = vector.shape_cast %5 : vector<1x16x128xbf16> to vector<16x128xbf16>
    %cst = arith.constant dense<0.000000e+00> : vector<128x128xf32>
    %7 = tpu.matmul %4, %6, %cst {dimension_numbers = #tpu.dot_dimension_numbers<[0], [0], [1], [1], [0, 1, 1, 1], [], []>} : vector<16x128xbf16>, vector<16x128xbf16>, vector<128x128xf32> -> vector<128x128xf32>
    %8 = arith.mulf %7, %7 : vector<128x128xf32>
    %c0_6 = arith.constant 0 : index
    %c0_7 = arith.constant 0 : index
    %c0_8 = arith.constant 0 : index
    %9 = vector.load %arg3[%c0_6, %c0_7, %c0_8] : memref<1x128x1xf32, #tpu.memory_space<vmem>>, vector<1x128x1xf32>
    %10 = vector.shape_cast %9 : vector<1x128x1xf32> to vector<128x1xf32>
    %c0_9 = arith.constant 0 : index
    %c0_10 = arith.constant 0 : index
    %c0_11 = arith.constant 0 : index
    %11 = vector.load %arg4[%c0_9, %c0_10, %c0_11] : memref<1x1x128xf32, #tpu.memory_space<vmem>>, vector<1x1x128xf32>
    %12 = vector.shape_cast %11 : vector<1x1x128xf32> to vector<1x128xf32>
    %13 = vector.broadcast %10 : vector<128x1xf32> to vector<128x128xf32>
    %14 = vector.broadcast %12 : vector<1x128xf32> to vector<128x128xf32>
    %15 = arith.cmpf oeq, %13, %14 : vector<128x128xf32>
    %cst_12 = arith.constant 0.000000e+00 : f32
    %16 = vector.broadcast %cst_12 : f32 to vector<128x128xf32>
    %17 = arith.select %15, %8, %16 : vector<128x128xi1>, vector<128x128xf32>
    %c0_13 = arith.constant 0 : index
    %c0_14 = arith.constant 0 : index
    %c0_15 = arith.constant 0 : index
    %c0_16 = arith.constant 0 : index
    %18 = vector.load %arg7[%c0_13, %c0_14, %c0_15, %c0_16] : memref<1x1x1x128xf32, #tpu.memory_space<vmem>>, vector<1x1x1x128xf32>
    %cst_17 = arith.constant dense<0.000000e+00> : vector<128xf32>
    %19 = vector.multi_reduction <add>, %8, %cst_17 [0] : vector<128x128xf32> to vector<128xf32>
    %20 = vector.shape_cast %19 : vector<128xf32> to vector<1x128xf32>
    %21 = vector.shape_cast %20 : vector<1x128xf32> to vector<1x1x1x128xf32>
    %22 = arith.addf %18, %21 : vector<1x1x1x128xf32>
    %c0_18 = arith.constant 0 : index
    %c0_19 = arith.constant 0 : index
    %c0_20 = arith.constant 0 : index
    %c0_21 = arith.constant 0 : index
    %23 = vector.load %arg7[%c0_18, %c0_19, %c0_20, %c0_21] : memref<1x1x1x128xf32, #tpu.memory_space<vmem>>, vector<1x1x1x128xf32>
    tpu.vector_store %arg7[%c0_18, %c0_19, %c0_20, %c0_21], %22 {strides = array<i32>} : memref<1x1x1x128xf32, #tpu.memory_space<vmem>>, vector<1x1x1x128xf32>,
    %c0_22 = arith.constant 0 : index
    %c0_23 = arith.constant 0 : index
    %c0_24 = arith.constant 0 : index
    %c0_25 = arith.constant 0 : index
    %24 = vector.load %arg8[%c0_22, %c0_23, %c0_24, %c0_25] : memref<1x1x1x128xf32, #tpu.memory_space<vmem>>, vector<1x1x1x128xf32>
    %cst_26 = arith.constant dense<0.000000e+00> : vector<128xf32>
    %25 = vector.multi_reduction <add>, %17, %cst_26 [0] : vector<128x128xf32> to vector<128xf32>
    %26 = vector.shape_cast %25 : vector<128xf32> to vector<1x128xf32>
    %27 = vector.shape_cast %26 : vector<1x128xf32> to vector<1x1x1x128xf32>
    %28 = arith.addf %24, %27 : vector<1x1x1x128xf32>
    %c0_27 = arith.constant 0 : index
    %c0_28 = arith.constant 0 : index
    %c0_29 = arith.constant 0 : index
    %c0_30 = arith.constant 0 : index
    %29 = vector.load %arg8[%c0_27, %c0_28, %c0_29, %c0_30] : memref<1x1x1x128xf32, #tpu.memory_space<vmem>>, vector<1x1x1x128xf32>
    tpu.vector_store %arg8[%c0_27, %c0_28, %c0_29, %c0_30], %28 {strides = array<i32>} : memref<1x1x1x128xf32, #tpu.memory_space<vmem>>, vector<1x1x1x128xf32>,
    return
  }
  func.func @transform_0(%arg0: i32, %arg1: i32, %arg2: i32) -> (i32, i32, i32) {
    %c0_i32 = arith.constant 0 : i32
    %c0_i32_0 = arith.constant 0 : i32
    return %arg0, %arg1, %c0_i32 : i32, i32, i32
  }
  func.func @transform_1(%arg0: i32, %arg1: i32, %arg2: i32) -> (i32, i32, i32) {
    %c0_i32 = arith.constant 0 : i32
    %c0_i32_0 = arith.constant 0 : i32
    return %arg0, %c0_i32, %arg2 : i32, i32, i32
  }
  func.func @transform_2(%arg0: i32, %arg1: i32, %arg2: i32) -> (i32, i32, i32) {
    %c0_i32 = arith.constant 0 : i32
    %c0_i32_0 = arith.constant 0 : i32
    return %arg0, %c0_i32, %arg1 : i32, i32, i32
  }
  func.func @transform_3(%arg0: i32, %arg1: i32, %arg2: i32) -> (i32, i32, i32) {
    %c0_i32 = arith.constant 0 : i32
    %c0_i32_0 = arith.constant 0 : i32
    return %arg0, %c0_i32, %arg2 : i32, i32, i32
  }
  func.func @transform_4(%arg0: i32, %arg1: i32, %arg2: i32) -> (i32, i32, i32, i32) {
    %c0_i32 = arith.constant 0 : i32
    %c0_i32_0 = arith.constant 0 : i32
    %c0_i32_1 = arith.constant 0 : i32
    return %arg0, %arg1, %c0_i32, %c0_i32_0 : i32, i32, i32, i32
  }
  func.func @transform_5(%arg0: i32, %arg1: i32, %arg2: i32) -> (i32, i32, i32, i32) {
    %c0_i32 = arith.constant 0 : i32
    %c0_i32_0 = arith.constant 0 : i32
    %c0_i32_1 = arith.constant 0 : i32
    return %arg0, %arg1, %c0_i32, %c0_i32_0 : i32, i32, i32, i32
  }
}

</mosaic_0001>

<bundles_post_ra>
// kernel: tpu_custom_call.1
= control target key start
LH: loop header
LB: loop body
LE: loop exit
PB: predicated region body
PF: predicated region fallthrough
CT: control target
= control target key end

     0   :  { %11 = vsyncpa [#allocation3], 0  ;;  %s1380_s0 = inlined_call_operand.vmem [shape: f32[2,128,1], index: 0, kind: input, shape index: {}]   ;;  %s1381_s1 = inlined_call_operand.vmem [shape: f32[2,1,128], index: 1, kind: input, shape index: {}]   ;;  %s1382_s2 = inlined_call_operand.vmem [shape: bf16[2,16,128], index: 2, kind: input, shape index: {}]   ;;  %s1383_s3 = inlined_call_operand.vmem [shape: bf16[2,16,128], index: 3, kind: input, shape index: {}]   ;;  %s1384_s4 = inlined_call_operand.hbm [shape: f32[2,1,1,128], index: 4, kind: output, shape index: {0}]   ;;  %s1385_s5 = inlined_call_operand.hbm [shape: f32[2,1,1,128], index: 5, kind: output, shape index: {1}]  }
   0x1   :  { %13 = vsyncpa [#allocation3 + $0x1], 0 }
   0x2   :  { %14 = vsyncpa [#allocation5], 0 }
   0x3   :  { %16 = vsyncpa [#allocation5 + $0x1], 0  ;;  %s1166_s18 = smov 0   ;;  %s1168_s19 = smov 0  }
   0x4   :  { %s1170_s20 = smov 0   ;;  %s1172_s21 = smov 0  }
   0x5   :  { %s1174_s22 = smov 0   ;;  %s1176_s23 = smov 0  }
   0x6 LB: > { %s900_s24 = sadd.s32 4294967295, %s1130_s23   ;;  %s901_s25 = sadd.s32 4294967294, %s1130_s23   ;;  %s1130_s23 = sphi %s1176_s23, %s22_s23   ;;  %s1126_s22 = sphi %s1174_s22, %s1392_s22   ;;  %s1122_s21 = sphi %s1172_s21, %s1391_s21   ;;  %s1118_s20 = sphi %s1170_s20, %s1390_s20   ;;  %s1114_s19 = sphi %s1168_s19, %s1389_s19   ;;  %s1110_s18 = sphi %s1166_s18, %s1388_s18  }
   0x7   : > { %s41_s26 = sadd.s32 1, %s1126_s22  ;;  %s162_s27 = sadd.s32 1, %s1118_s20 }
   0x8   : > { %p43_p0 = scmp.ge.s32.totalorder %s41_s26, 2  ;;  %p172_p1 = scmp.ne.s32.totalorder %s1118_s20, %s1114_s19 }
   0x9   : > { %p173_p2 = scmp.eq.s32.totalorder %s900_s24, 1  ;;  %p178_p3 = scmp.ne.s32.totalorder %s1114_s19, %s1110_s18 }
   0xa   : > { %s1394_s26 = smov (%p43_p0, %s41_s26), 0  ;;  %p179_p5 = scmp.eq.s32.totalorder %s901_s25, 1 }
   0xb   : > { %p1206_p4 = por %p173_p2, %p172_p1  ;;  %s157_s29 = ssub.s32 %s1126_s22, %s1394_s26 }
   0xc   : > { %p904_p6 = scmp.ge.s32.totalorder %s1130_s23, 1  ;;  %p160_p7 = scmp.eq.s32.totalorder %s157_s29, 0 }
   0xd   : > { %p1213_p8 = por %p179_p5, %p178_p3  ;;  %p269_p9 = scmp.lt.s32.totalorder %s1130_s23, 3 }
   0xe   : > { %s1219_s6 = scalar_select %p160_p7, %s1118_s20, %s162_s27  }
   0xf   : > { %p270_p10 = pnand %p904_p6, %p269_p9 }
  0x10   : > { %p327_p11 = scmp.lt.s32.totalorder (!%p270_p10), %s1122_s21, 1  ;;  %s1263_s25 = sand.u32 (!%p270_p10), 1, %s1114_s19  }
  0x11   : > { %273 = sbr.rel (%p270_p10) target bundleno = 410 (0x19a), region = 36  ;;  %s1266_s27 = scalar_lea.vmem (!%p270_p10), [#allocation2], %s1263_s25 }
  0x12   : > { %s1270_s29 = scalar_lea.vmem (!%p270_p10), [#allocation4], %s1263_s25  ;;  %s736_s11 = sshll.u32 (!%p270_p10), %s1266_s27, 4  ;;  %s1305_s11 = int_to_ptr.vmem [resolvable:$true] %s736_s11 }
  0x16   : > { %v1132_v0 = vmov 0   ;;  %s1223_s7 = scalar_select %p327_p11, %s1122_s21, 1  ;;  %vm397_vm0 = vcmask 130048   ;;  %v1133_v27 = vmov 0.0  }
  0x17   : > { %1021 = vset.pattern.permute.xlu1 %v1132_v0  ;;  %363 = vst [vmem:[%s1266_s27] sm:$0x1] %v1133_v27  ;;  %364 = vst [vmem:[%s1270_s29] sm:$0x1] %v1133_v27 }
  0x18   : > { %s927_s8 = sshll.u32 %s1223_s7, 3  ;;  %s926_s9 = sshll.u32 %s1223_s7, 7 }
  0x19   : > { %s349_s12 = scalar_lea.vmem %s1382_s2, %s927_s8  ;;  %s357_s15 = scalar_lea.vmem %s1383_s3, %s927_s8 }
  0x1a   : > { %s1236_s24 = scalar_lea.vmem %s1380_s0, %s926_s9  ;;  %v1022_v1 = vld [vmem:[%s349_s12] sm:$0xff]   ;;  %s341_s10 = scalar_lea.vmem %s1381_s1, %s1223_s7 }
  0x1b   : > { %v1023_v2 = vld [vmem:[%s357_s15] sm:$0xff]   ;;  %v536_v3 = vld [vmem:[%s1236_s24 + $0x8] sm:$0xff]  ;;  %375 = vxpose.xlu0.c.b16.start.end [1/1] (short) %v1022_v1, 128  ;;  %v537_v4 = vld [vmem:[%s1236_s24 + $0x10] sm:$0xff]  ;;  %s922_s7 = sshll.u32 %s1122_s21, 4  ;;  %s750_s12 = sshll.u32 %s1270_s29, 4  ;;  %s1312_s12 = int_to_ptr.vmem [resolvable:$true] %s750_s12 }
  0x1c   : > { %938 = vmatprep.subr.bf16.mxu0 %v1023_v2  ;;  %559 = vperm.xlu1 %1021, %v536_v3   ;;  %v538_v5 = vld [vmem:[%s1236_s24 + $0x18] sm:$0xff]  ;;  %v539_v6 = vld [vmem:[%s1236_s24 + $0x20] sm:$0xff]  ;;  %v540_v7 = vld [vmem:[%s1236_s24 + $0x28] sm:$0xff]  ;;  %s1303_s15 = scalar_lea.hbm %s1384_s4, %s922_s7  ;;  %s1310_s17 = scalar_lea.hbm %s1385_s5, %s922_s7 }
  0x1d   : > { %939 = vmatpush3.bf16.msra.mxu0 %v1023_v2  ;;  %956 = vmatprep.subr.bf16.mxu1 %v1023_v2  ;;  %v541_v8 = vld [vmem:[%s1236_s24 + $0x30] sm:$0xff]  ;;  %v542_v9 = vld [vmem:[%s1236_s24 + $0x38] sm:$0xff]  ;;  %v543_v10 = vld [vmem:[%s1236_s24 + $0x40] sm:$0xff]  ;;  %s1024_s8 = scalar_lea.vmem %s1305_s11, 16  ;;  %s1134_s9 = smov [#allocation2]  }
  0x1e   : > { %957 = vmatpush3.bf16.msra.mxu1 %v1023_v2  ;;  %v544_v11 = vld [vmem:[%s1236_s24 + $0x48] sm:$0xff]  ;;  %v545_v12 = vld [vmem:[%s1236_s24 + $0x50] sm:$0xff]  ;;  %v535_v13 = vld [vmem:[%s1236_s24] sm:$0xff]  ;;  %p1025_p12 = scmp.ne.s32.totalorder %s1305_s11, %s1024_s8 }
  0x1f   : > { %v546_v14 = vld [vmem:[%s1236_s24 + $0x58] sm:$0xff]  ;;  %v547_v15 = vld [vmem:[%s1236_s24 + $0x60] sm:$0xff]  ;;  %v548_v16 = vld [vmem:[%s1236_s24 + $0x68] sm:$0xff] }
  0x20   : > { %564 = vperm.xlu1 %1021, %v537_v4   ;;  %v549_v17 = vld [vmem:[%s1236_s24 + $0x70] sm:$0xff]  ;;  %v550_v18 = vld [vmem:[%s1236_s24 + $0x78] sm:$0xff]  ;;  %v1277_v39 = vld [vmem:[%s341_s10] ss:$0 sm:$0xff]  ;;  %s719_s24 = scalar_lea.sflag [#allocation3], %s1263_s25  ;;  %p1026_p13 = pnand %p1025_p12, %p1206_p4 }
  0x21   : > { %s1028_s10 = sshll.u32 %s1134_s9, 4  ;;  %s1029_s10 = int_to_ptr.vmem [resolvable:$false] %s1028_s10 }
  0x22   : > { %p1027_p0 = pneg %p1026_p13  ;;  %s1030_s13 = scalar_lea.vmem %s1029_s10, 32 }
  0x23   : > { %p1031_p1 = scmp.lt.s32.totalorder %s1305_s11, %s1029_s10  ;;  %p1032_p2 = scmp.lt.s32.totalorder %s1030_s13, %s1024_s8 }
  0x24   : > { %569 = vperm.xlu1 %1021, %v538_v5   ;;  %1020 = vset.pattern.permute.xlu0 %v1132_v0 }
  0x25   : > { %p1033_p3 = por %p1032_p2, %p1031_p1 }
  0x27   : > { %p1034_p5 = pnand %p1033_p3, %p1027_p0 }
  0x28   : > { %574 = vperm.xlu1 %1021, %v539_v6  }
  0x2c   : > { %579 = vperm.xlu1 %1021, %v540_v7  }
  0x30   : > { %584 = vperm.xlu1 %1021, %v541_v8  }
  0x34   : > { %589 = vperm.xlu1 %1021, %v542_v9  }
  0x38   : > { %594 = vperm.xlu1 %1021, %v543_v10  }
  0x3c   : > { %599 = vperm.xlu1 %1021, %v544_v11  }
  0x40   : > { %604 = vperm.xlu1 %1021, %v545_v12   ;;  %554 = vperm.xlu0 %1020, %v535_v13  }
  0x44   : > { %609 = vperm.xlu1 %1021, %v546_v14   ;;  %614 = vperm.xlu0 %1020, %v547_v15  }
  0x48   : > { %619 = vperm.xlu1 %1021, %v548_v16   ;;  %624 = vperm.xlu0 %1020, %v549_v17  }
  0x4c   : > { %629 = vperm.xlu1 %1021, %v550_v18  }
  0x7d   : > { %v383_v19 = vpop.trf.xlu0 }
  0x7e   : > { %940 = vmatprep.mubr.msk.bf16.mxu0 %vm397_vm0, %v383_v19 }
  0x81   : > { %v384_v20 = vpop.trf.xlu0 }
  0x82   : > { %941 = vmatmul.mubr.msk.bf16.vlgmr.msra.gmra.mxu0 %vm397_vm0, %v384_v20 }
  0x85   : > { %v385_v21 = vpop.trf.xlu0 }
  0x86   : > { %944 = vmatprep.mubr.msk.bf16.mxu0 %vm397_vm0, %v385_v21 }
  0x89   : > { %v386_v22 = vpop.trf.xlu0 }
  0x8a   : > { %945 = vmatmul.mubr.msk.bf16.gmra.mxu0 %vm397_vm0, %v386_v22 }
  0x8d   : > { %v387_v23 = vpop.trf.xlu0 }
  0x8e   : > { %948 = vmatprep.mubr.msk.bf16.mxu1 %vm397_vm0, %v387_v23 }
  0x91   : > { %v388_v24 = vpop.trf.xlu0 }
  0x92   : > { %949 = vmatmul.mubr.msk.bf16.vlgmr.msra.gmra.mxu1 %vm397_vm0, %v388_v24 }
  0x95   : > { %v389_v25 = vpop.trf.xlu0 }
  0x96   : > { %952 = vmatprep.mubr.msk.bf16.mxu1 %vm397_vm0, %v389_v25 }
  0x97   : > { %v560_v28 = vpop.permute.xlu1 %559 }
  0x98   : > { %vm639_vm2 = vcmp.eq.f32.partialorder %v560_v28, %v1277_v39 }
  0x99   : > { %v390_v26 = vpop.trf.xlu0 }
  0x9a   : > { %953 = vmatmul.mubr.msk.bf16.gmra.mxu1 %vm397_vm0, %v390_v26 }
  0x9b   : > { %v565_v29 = vpop.permute.xlu1 %564 }
  0x9c   : > { %vm640_vm3 = vcmp.eq.f32.partialorder %v565_v29, %v1277_v39 }
  0x9f   : > { %v570_v30 = vpop.permute.xlu1 %569 }
  0xa0   : > { %vm641_vm4 = vcmp.eq.f32.partialorder %v570_v30, %v1277_v39 }
  0xa3   : > { %v575_v31 = vpop.permute.xlu1 %574 }
  0xa4   : > { %vm642_vm5 = vcmp.eq.f32.partialorder %v575_v31, %v1277_v39 }
  0xa7   : > { %v580_v32 = vpop.permute.xlu1 %579 }
  0xa8   : > { %vm643_vm6 = vcmp.eq.f32.partialorder %v580_v32, %v1277_v39 }
  0xab   : > { %v585_v33 = vpop.permute.xlu1 %584 }
  0xac   : > { %vm644_vm7 = vcmp.eq.f32.partialorder %v585_v33, %v1277_v39 }
  0xaf   : > { %v590_v34 = vpop.permute.xlu1 %589 }
  0xb0   : > { %vm645_vm8 = vcmp.eq.f32.partialorder %v590_v34, %v1277_v39 }
  0xb3   : > { %v595_v37 = vpop.permute.xlu1 %594 }
  0xb4   : > { %vm646_vm9 = vcmp.eq.f32.partialorder %v595_v37, %v1277_v39 }
  0xb7   : > { %v600_v46 = vpop.permute.xlu1 %599 }
  0xb8   : > { %vm647_vm10 = vcmp.eq.f32.partialorder %v600_v46, %v1277_v39 }
  0xbb   : > { %v555_v40 = vpop.permute.xlu0 %554  ;;  %v605_v62 = vpop.permute.xlu1 %604 }
  0xbc   : > { %vm638_vm1 = vcmp.eq.f32.partialorder %v555_v40, %v1277_v39  ;;  %vm648_vm11 = vcmp.eq.f32.partialorder %v605_v62, %v1277_v39 }
  0xbf   : > { %v610_v15 = vpop.permute.xlu1 %609  ;;  %v615_v26 = vpop.permute.xlu0 %614 }
  0xc0   : > { %vm649_vm12 = vcmp.eq.f32.partialorder %v610_v15, %v1277_v39  ;;  %vm650_vm13 = vcmp.eq.f32.partialorder %v615_v26, %v1277_v39 }
  0xc3   : > { %v620_v32 = vpop.permute.xlu1 %619 }
  0xc4   : > { %vm651_vm14 = vcmp.eq.f32.partialorder %v620_v32, %v1277_v39 }
 0x142   : > { %v942_v35 = vpop.f32.mrf.mxu0 }
 0x143   : > { %v521_v43 = vmul.f32 %v942_v35, %v942_v35 }
 0x144   : > { %v456_v36 = vpop.f32.mrf.mxu0 }
 0x145   : > { %v519_v41 = vmul.f32 %v456_v36, %v456_v36  ;;  %v656_v53 = vsel %vm640_vm3, %v521_v43, 0.0 }
 0x146   : > { %v943_v38 = vpop.f32.mrf.mxu0 }
 0x147   : > { %v654_v47 = vsel %vm638_vm1, %v519_v41, 0.0  ;;  %v522_v48 = vmul.f32 %v943_v38, %v943_v38 }
 0x148   : > { %v459_v42 = vpop.f32.mrf.mxu0 }
 0x149   : > { %v520_v44 = vmul.f32 %v459_v42, %v459_v42  ;;  %v657_v58 = vsel %vm641_vm4, %v522_v48, 0.0 }
 0x14a   : > { %v946_v45 = vpop.f32.mrf.mxu0 }
 0x14b   : > { %v655_v49 = vsel %vm639_vm2, %v520_v44, 0.0  ;;  %v671_v50 = vadd.f32 %v520_v44, %v519_v41  ;;  %v525_v63 = vmul.f32 %v946_v45, %v946_v45 }
 0x14c   : > { %v695_v51 = vadd.f32 %v655_v49, %v654_v47  ;;  %v472_v52 = vpop.f32.mrf.mxu0  ;;  %v630_v49 = vpop.permute.xlu1 %629 }
 0x14d   : > { %v672_v54 = vadd.f32 %v671_v50, %v521_v43  ;;  %v523_v55 = vmul.f32 %v472_v52, %v472_v52  ;;  %v660_v10 = vsel %vm644_vm7, %v525_v63, 0.0  ;;  %v625_v43 = vpop.permute.xlu0 %624  ;;  %vm653_vm0 = vcmp.eq.f32.partialorder %v630_v49, %v1277_v39 }
 0x14e   : > { %v696_v56 = vadd.f32 %v695_v51, %v656_v53  ;;  %v947_v57 = vpop.f32.mrf.mxu0  ;;  %vm652_vm15 = vcmp.eq.f32.partialorder %v625_v43, %v1277_v39  ;;  %v670_v39 = vld [vmem:[%s1266_s27] sm:$0x1] }
 0x14f   : > { %v673_v59 = vadd.f32 %v672_v54, %v522_v48  ;;  %v658_v0 = vsel %vm642_vm5, %v523_v55, 0.0  ;;  %v526_v5 = vmul.f32 %v947_v57, %v947_v57 }
 0x150   : > { %v697_v60 = vadd.f32 %v696_v56, %v657_v58  ;;  %v475_v61 = vpop.f32.mrf.mxu0 }
 0x151   : > { %v674_v1 = vadd.f32 %v673_v59, %v523_v55  ;;  %v524_v2 = vmul.f32 %v475_v61, %v475_v61  ;;  %v661_v16 = vsel %vm645_vm8, %v526_v5, 0.0 }
 0x152   : > { %v698_v3 = vadd.f32 %v697_v60, %v658_v0  ;;  %v950_v4 = vpop.f32.mrf.mxu1 }
 0x153   : > { %v659_v6 = vsel %vm643_vm6, %v524_v2, 0.0  ;;  %v675_v7 = vadd.f32 %v674_v1, %v524_v2  ;;  %v529_v20 = vmul.f32 %v950_v4, %v950_v4 }
 0x154   : > { %v699_v8 = vadd.f32 %v698_v3, %v659_v6  ;;  %v488_v9 = vpop.f32.mrf.mxu1 }
 0x155   : > { %v676_v11 = vadd.f32 %v675_v7, %v525_v63  ;;  %v527_v12 = vmul.f32 %v488_v9, %v488_v9  ;;  %v664_v33 = vsel %vm648_vm11, %v529_v20, 0.0  ;;  %v694_v7 = vld [vmem:[%s1270_s29] sm:$0x1] }
 0x156   : > { %v700_v13 = vadd.f32 %v699_v8, %v660_v10  ;;  %v951_v14 = vpop.f32.mrf.mxu1 }
 0x157   : > { %v677_v17 = vadd.f32 %v676_v11, %v526_v5  ;;  %v662_v21 = vsel %vm646_vm9, %v527_v12, 0.0  ;;  %v530_v27 = vmul.f32 %v951_v14, %v951_v14 }
 0x158   : > { %v701_v18 = vadd.f32 %v700_v13, %v661_v16  ;;  %v491_v19 = vpop.f32.mrf.mxu1 }
 0x159   : > { %v678_v22 = vadd.f32 %v677_v17, %v527_v12  ;;  %v528_v23 = vmul.f32 %v491_v19, %v491_v19  ;;  %v665_v38 = vsel %vm649_vm12, %v530_v27, 0.0 }
 0x15a   : > { %v702_v24 = vadd.f32 %v701_v18, %v662_v21  ;;  %v954_v25 = vpop.f32.mrf.mxu1 }
 0x15b   : > { %v663_v28 = vsel %vm647_vm10, %v528_v23, 0.0  ;;  %v679_v29 = vadd.f32 %v678_v22, %v528_v23  ;;  %v533_v44 = vmul.f32 %v954_v25, %v954_v25 }
 0x15c   : > { %v703_v30 = vadd.f32 %v702_v24, %v663_v28  ;;  %v504_v31 = vpop.f32.mrf.mxu1 }
 0x15d   : > { %v680_v34 = vadd.f32 %v679_v29, %v529_v20  ;;  %v531_v35 = vmul.f32 %v504_v31, %v504_v31  ;;  %v668_v54 = vsel %vm652_vm15, %v533_v44, 0.0 }
 0x15e   : > { %v704_v36 = vadd.f32 %v703_v30, %v664_v33  ;;  %v955_v37 = vpop.f32.mrf.mxu1 }
 0x15f   : > { %v681_v40 = vadd.f32 %v680_v34, %v530_v27  ;;  %v666_v45 = vsel %vm650_vm13, %v531_v35, 0.0  ;;  %v534_v50 = vmul.f32 %v955_v37, %v955_v37 }
 0x160   : > { %v705_v41 = vadd.f32 %v704_v36, %v665_v38  ;;  %v507_v42 = vpop.f32.mrf.mxu1 }
 0x161   : > { %v682_v46 = vadd.f32 %v681_v40, %v531_v35  ;;  %v532_v47 = vmul.f32 %v507_v42, %v507_v42  ;;  %v669_v57 = vsel %vm653_vm0, %v534_v50, 0.0 }
 0x162   : > { %v706_v48 = vadd.f32 %v705_v41, %v666_v45 }
 0x163   : > { %v667_v51 = vsel %vm651_vm14, %v532_v47, 0.0  ;;  %v683_v52 = vadd.f32 %v682_v46, %v532_v47 }
 0x164   : > { %v707_v53 = vadd.f32 %v706_v48, %v667_v51 }
 0x165   : > { %v684_v55 = vadd.f32 %v683_v52, %v533_v44 }
 0x166   : > { %v708_v56 = vadd.f32 %v707_v53, %v668_v54 }
 0x167   : > { %v685_v58 = vadd.f32 %v684_v55, %v534_v50 }
 0x168   : > { %v709_v59 = vadd.f32 %v708_v56, %v669_v57 }
 0x169   : > { %v686_v60 = vrot.slane %v685_v58, 4 }
 0x16a   : > { %v710_v61 = vrot.slane %v709_v59, 4 }
 0x16b   : > { %v687_v62 = vadd.f32 %v686_v60, %v685_v58 }
 0x16c   : > { %v711_v63 = vadd.f32 %v710_v61, %v709_v59 }
 0x16d   : > { %v688_v0 = vrot.slane %v687_v62, 2 }
 0x16e   : > { %v712_v1 = vrot.slane %v711_v63, 2 }
 0x16f   : > { %v689_v2 = vadd.f32 %v688_v0, %v687_v62 }
 0x170   : > { %v713_v3 = vadd.f32 %v712_v1, %v711_v63 }
 0x171   : > { %v690_v4 = vrot.slane %v689_v2, 1 }
 0x172   : > { %v714_v5 = vrot.slane %v713_v3, 1 }
 0x173   : > { %v691_v6 = vadd.f32 %v690_v4, %v689_v2 }
 0x174   : > { %v715_v8 = vadd.f32 %v714_v5, %v713_v3 }
 0x175   : > { %v692_v9 = vadd.f32 %v691_v6, %v670_v39 }
 0x176   : > { %v716_v10 = vadd.f32 %v715_v8, %v694_v7 }
 0x177   : > { %693 = vst [vmem:[%s1266_s27] sm:$0x1] %v692_v9 }
 0x178   : > { %1037 = shalt.err (!%p1034_p5)
}
 0x179   : > { %s1038_s27 = scalar_lea.hbm %s1303_s15, 16  ;;  %s1042_s21 = scalar_lea.hbm %s1384_s4, 32 }
 0x17a   : > { %p1039_p6 = scmp.ne.s32.totalorder %s1303_s15, %s1038_s27  ;;  %p1043_p10 = scmp.lt.s32.totalorder %s1303_s15, %s1384_s4 }
 0x17b   : > { %p1044_p11 = scmp.lt.s32.totalorder %s1042_s21, %s1038_s27 }
 0x17c   : > { %p1040_p7 = pnand %p1039_p6, %p1206_p4 }
 0x17d   : > { %p1045_p12 = por %p1044_p11, %p1043_p10 }
 0x17e   : > { %p1041_p9 = pneg %p1040_p7 }
 0x180   : > { %p1046_p13 = pnand %p1045_p12, %p1041_p9 }
 0x182   : > { %1049 = shalt.err (!%p1046_p13)
}
 0x183   : > { %958 = dma.vmem_to_hbm [thread:$0]  (%p1206_p4), %s1305_s11, 16, %s1303_s15, %s719_s24   ;;  %717 = vst [vmem:[%s1270_s29] sm:$0x1] %v716_v10 }
 0x184   : > { %s723_s8 = scalar_lea.sflag [#allocation5], %s1263_s25  ;;  %s1050_s10 = scalar_lea.vmem %s1312_s12, 16 }
 0x185   : > { %p1051_p0 = scmp.ne.s32.totalorder %s1312_s12, %s1050_s10  ;;  %s1135_s13 = smov [#allocation4]  }
 0x186   : > { %s1054_s27 = sshll.u32 %s1135_s13, 4  ;;  %s1055_s27 = int_to_ptr.vmem [resolvable:$false] %s1054_s27 }
 0x187   : > { %p1052_p1 = pnand %p1051_p0, %p1206_p4  ;;  %s1056_s7 = scalar_lea.vmem %s1055_s27, 32 }
 0x188   : > { %p1057_p3 = scmp.lt.s32.totalorder %s1312_s12, %s1055_s27  ;;  %p1058_p5 = scmp.lt.s32.totalorder %s1056_s7, %s1050_s10 }
 0x189   : > { %p1053_p2 = pneg %p1052_p1 }
 0x18a   : > { %p1059_p6 = por %p1058_p5, %p1057_p3 }
 0x18c   : > { %p1060_p7 = pnand %p1059_p6, %p1053_p2 }
 0x18e   : > { %1063 = shalt.err (!%p1060_p7)
}
 0x18f   : > { %s1064_s29 = scalar_lea.hbm %s1310_s17, 16  ;;  %s1068_s15 = scalar_lea.hbm %s1385_s5, 32 }
 0x190   : > { %p1065_p9 = scmp.ne.s32.totalorder %s1310_s17, %s1064_s29  ;;  %p1069_p12 = scmp.lt.s32.totalorder %s1310_s17, %s1385_s5 }
 0x191   : > { %p1070_p13 = scmp.lt.s32.totalorder %s1068_s15, %s1064_s29 }
 0x192   : > { %p1066_p10 = pnand %p1065_p9, %p1206_p4 }
 0x193   : > { %p1071_p0 = por %p1070_p13, %p1069_p12 }
 0x194   : > { %p1067_p11 = pneg %p1066_p10 }
 0x196   : > { %p1072_p1 = pnand %p1071_p0, %p1067_p11 }
 0x198   : > { %1075 = shalt.err (!%p1072_p1)
}
 0x199   : > { %959 = dma.vmem_to_hbm [thread:$0]  (%p1206_p4), %s1312_s12, 16, %s1310_s17, %s723_s8  }
 0x19a PF: > { %p969_p2 = scmp.ge.s32.totalorder %s1130_s23, 2  ;;  %s762_s21 = sand.u32 1, %s1110_s18  }
 0x19b   : > { %s763_s16 = scalar_lea.sflag [#allocation3], %s762_s21 }
 0x19c   : > { %p963_p3 = pnand %p969_p2, %p1213_p8 }
 0x19e   : > { %p964_p5 = pneg %p963_p3 }
 0x1a0   : > { %1101 = dma.done.wait (%p964_p5), %s763_s16, 16  }
 0x1a1   : > { %1103 = vsyncadd (%p964_p5), %s763_s16, 4294967280  ;;  %s771_s9 = scalar_lea.sflag [#allocation5], %s762_s21 }
 0x1a2   : > { %1105 = dma.done.wait (%p964_p5), %s771_s9, 16  }
 0x1a3   : > { %1107 = vsyncadd (%p964_p5), %s771_s9, 4294967280  ;;  %s22_s23 = sadd.s32 1, %s1130_s23   ;;  %s1388_s18 = smov %s1114_s19 }
 0x1a4   : > { %p19_p6 = scmp.ge.s32.totalorder %s22_s23, 4   ;;  %s1389_s19 = smov %s1118_s20 }
 0x1a5   : > { %s1390_s20 = smov %s1219_s6  ;;  %s1391_s21 = smov %s1126_s22 }
 0x1a6   : > { %s1392_s22 = smov %s1394_s26  ;;  %21 = sbr.rel (!%p19_p6) target bundleno = 6 (0x6), region = 101 }
 0x1ab   :  { %775 = vsyncpa [#allocation3], 1 }
 0x1ac   :  { %777 = vsyncpa [#allocation3 + $0x1], 1 }
 0x1ad   :  { %778 = vsyncpa [#allocation5], 1 }
 0x1ae   :  { %780 = vsyncpa [#allocation5 + $0x1], 1 }

</bundles_post_ra>
